<compile_context>
chip_gen: v6e
topology: v6e:2x2x1
jax: 0.10.0
libtpu: 0.0.40
codegen_flags: <defaults>
</compile_context>

<pallas_src>
import functools

import jax
import jax.numpy as jnp
from jax.experimental import pallas as pl
from jax.experimental.pallas import tpu as pltpu

P = 50          # hardcoded in the PyTorch module
TOK = 1 + P     # class token + P part tokens = 51
T = 64          # padded token extent (multiple of 8, >= TOK)


def _part_cam_kernel(att_ref, feat_ref, out_ref, *, num_layers):
    # att_ref : [Bt, L, T, T]  bf16   (zero outside the 51x51 sub-block)
    # feat_ref: [Bt, T, D]     bf16   (row 0 and rows >= 1+P are zero)
    # out_ref : [Bt, D]        f32
    #
    # Only the class-token row of the chained product is consumed, so chain a
    # row vector:  e0^T @ att[L-1] @ att[L-2] @ ... @ att[0].
    r = att_ref[:, num_layers - 1, 0:1, :].astype(jnp.float32)       # [Bt, 1, T]
    for i in range(num_layers - 2, -1, -1):                          # static unroll
        a = att_ref[:, i, :, :]                                      # [Bt, T, T] bf16
        r = jnp.einsum("bqt,bts->bqs", r.astype(jnp.bfloat16), a,
                       preferred_element_type=jnp.float32)           # [Bt, 1, T] f32

    feat = jnp.maximum(feat_ref[...], 0)                             # relu (VPU), bf16
    cam = jnp.einsum("bqt,btd->bqd", r.astype(jnp.bfloat16), feat,
                     preferred_element_type=jnp.float32)             # [Bt, 1, D] f32
    out_ref[...] = cam[:, 0, :]


def _pick_batch_tile(B):
    # Bt == B (single step, full-dim blocks) for small batches; otherwise Bt = 8
    # (sublane-aligned output rows) which also keeps the grid length >= 2 for
    # B >= 16 so both v7x TensorCores get work.
    if B <= 8:
        return B, B
    Bt = 8
    B_pad = ((B + Bt - 1) // Bt) * Bt
    return Bt, B_pad


def part_cam_pallas(x_list, features, lmbd=4):
    """Pallas implementation of Part_CAM.forward.

    x_list   : list of [B, S, S] float arrays (S >= 1+P)
    features : [B, N, D] float array (N >= 1+P)
    returns  : [B, 1, D] float32
    """
    del lmbd  # dead code in the PyTorch forward
    L = len(x_list)
    B, S, _ = x_list[0].shape
    _, N, D = features.shape
    assert S >= TOK and N >= TOK

    Bt, B_pad = _pick_batch_tile(B)

    # --- glue: top-left (1+P)x(1+P) sub-blocks, packed in bf16, zero-padded ---
    # TODO(synk): a fully copy-free variant would pass the L raw [B, S, S] maps
    # as separate pallas inputs and mask tokens >= 51 in-kernel; bf16 packing
    # already halves this one-off HBM materialization.
    att = jnp.stack([xi[:, :TOK, :TOK] for xi in x_list],
                    axis=1).astype(jnp.bfloat16)                      # [B, L, 51, 51]
    att = jnp.pad(att, ((0, B_pad - B), (0, 0),
                        (0, T - TOK), (0, T - TOK)))                  # [B_pad, L, T, T]

    # part-token features, shifted so row index matches attention column index.
    feat = features[:, 1:1 + P, :].astype(jnp.bfloat16)               # [B, P, D]
    feat = jnp.pad(feat, ((0, B_pad - B), (1, T - 1 - P), (0, 0)))    # [B_pad, T, D]

    kernel = functools.partial(_part_cam_kernel, num_layers=L)

    out = pl.pallas_call(
        kernel,
        out_shape=jax.ShapeDtypeStruct((B_pad, D), jnp.float32),      # lane-dense rows
        grid=(B_pad // Bt,),
        in_specs=[
            pl.BlockSpec((Bt, L, T, T), lambda b: (b, 0, 0, 0)),      # att  -> [Bt,L,T,T]
            pl.BlockSpec((Bt, T, D), lambda b: (b, 0, 0)),            # feat -> [Bt,T,D]
        ],
        out_specs=pl.BlockSpec((Bt, D), lambda b: (b, 0)),            # out  -> [Bt,D]
        compiler_params=pltpu.CompilerParams(
            dimension_semantics=("parallel",)),
    )(att, feat)

    return out[:B, None, :]                                           # [B, 1, D]


def part_cam_reference(x_list, features):
    """Plain-JAX f32 reference matching the PyTorch forward exactly."""
    att_tt = [xi[:, :TOK, :TOK].astype(jnp.float32) for xi in x_list]
    last = att_tt[0]
    for i in range(1, len(att_tt)):
        last = jnp.einsum("bij,bjk->bik", att_tt[i], last)
    last1 = last[:, 0:1, 1:1 + P]                                     # [B, 1, P]
    feat_map = jax.nn.relu(features[:, 1:1 + P].astype(jnp.float32))
    return jnp.einsum("bip,bpd->bid", last1, feat_map)                # [B, 1, D]


if __name__ == "__main__":
    key = jax.random.PRNGKey(0)
    B, L, D = 2, 3, 32
    S = 64                      # total tokens per attention map (>= 1 + P = 51)
    N = 64                      # tokens in `features`

    keys = jax.random.split(key, L + 1)
    # softmax-normalized rows so the inputs look like attention maps
    x_list = [jax.nn.softmax(jax.random.normal(keys[i], (B, S, S)), axis=-1)
              for i in range(L)]
    features = jax.random.normal(keys[L], (B, N, D), dtype=jnp.float32)

    out = part_cam_pallas(x_list, features, lmbd=4)
    out = jax.block_until_ready(out)

    ref = part_cam_reference(x_list, features)
    assert out.shape == (B, 1, D)
    # bf16 MXU operands (f32 accumulation) -> loosened tolerance vs f32 reference
    assert jnp.allclose(out, ref, atol=2e-2, rtol=2e-2), (
        f"max err {jnp.max(jnp.abs(out - ref))}")
    print("KERNEL_OK")
</pallas_src>

<mosaic_0001>
module attributes {stable_mosaic.version = 11 : i64} {
  func.func @_part_cam_kernel(%arg0: i32, %arg1: memref<2x3x64x64xbf16, #tpu.memory_space<vmem>>, %arg2: memref<2x64x32xbf16, #tpu.memory_space<vmem>>, %arg3: memref<2x32xf32, #tpu.memory_space<vmem>>) attributes {dimension_semantics = [#tpu.dimension_semantics<parallel>], iteration_bounds = array<i64: 1>, scalar_prefetch = 0 : i64, scratch_operands = 0 : i64, tpu.core_type = #tpu.core_type<tc>, window_params = [{transform_indices = @transform_0, window_bounds = array<i64: 2, 3, 64, 64>}, {transform_indices = @transform_1, window_bounds = array<i64: 2, 64, 32>}, {transform_indices = @transform_2, window_bounds = array<i64: 2, 32>}]} {
    %c0 = arith.constant 0 : index
    %c2 = arith.constant 2 : index
    %c0_0 = arith.constant 0 : index
    %c0_1 = arith.constant 0 : index
    %0 = vector.load %arg1[%c0, %c2, %c0_0, %c0_1] : memref<2x3x64x64xbf16, #tpu.memory_space<vmem>>, vector<2x1x1x64xbf16>
    %1 = vector.shape_cast %0 : vector<2x1x1x64xbf16> to vector<2x1x64xbf16>
    %2 = arith.extf %1 : vector<2x1x64xbf16> to vector<2x1x64xf32>
    %c0_2 = arith.constant 0 : index
    %c1 = arith.constant 1 : index
    %c0_3 = arith.constant 0 : index
    %c0_4 = arith.constant 0 : index
    %3 = vector.load %arg1[%c0_2, %c1, %c0_3, %c0_4] : memref<2x3x64x64xbf16, #tpu.memory_space<vmem>>, vector<2x1x64x64xbf16>
    %4 = vector.shape_cast %3 : vector<2x1x64x64xbf16> to vector<2x64x64xbf16>
    %5 = arith.truncf %2 : vector<2x1x64xf32> to vector<2x1x64xbf16>
    "tpu.trace_start"() <{level = 10 : i32, message = "bqt,bts->bqs"}> : () -> ()
    %cst = arith.constant dense<0.000000e+00> : vector<2x1x64xf32>
    %6 = tpu.matmul %5, %4, %cst {dimension_numbers = #tpu.dot_dimension_numbers<[2], [1], [1], [2], [0, 0, 0, 1, 1, 2], [0], [0]>} : vector<2x1x64xbf16>, vector<2x64x64xbf16>, vector<2x1x64xf32> -> vector<2x1x64xf32>
    "tpu.trace_stop"() : () -> ()
    %c0_5 = arith.constant 0 : index
    %c0_6 = arith.constant 0 : index
    %c0_7 = arith.constant 0 : index
    %c0_8 = arith.constant 0 : index
    %7 = vector.load %arg1[%c0_5, %c0_6, %c0_7, %c0_8] : memref<2x3x64x64xbf16, #tpu.memory_space<vmem>>, vector<2x1x64x64xbf16>
    %8 = vector.shape_cast %7 : vector<2x1x64x64xbf16> to vector<2x64x64xbf16>
    %9 = arith.truncf %6 : vector<2x1x64xf32> to vector<2x1x64xbf16>
    "tpu.trace_start"() <{level = 10 : i32, message = "bqt,bts->bqs"}> : () -> ()
    %cst_9 = arith.constant dense<0.000000e+00> : vector<2x1x64xf32>
    %10 = tpu.matmul %9, %8, %cst_9 {dimension_numbers = #tpu.dot_dimension_numbers<[2], [1], [1], [2], [0, 0, 0, 1, 1, 2], [0], [0]>} : vector<2x1x64xbf16>, vector<2x64x64xbf16>, vector<2x1x64xf32> -> vector<2x1x64xf32>
    "tpu.trace_stop"() : () -> ()
    %c0_10 = arith.constant 0 : index
    %c0_11 = arith.constant 0 : index
    %c0_12 = arith.constant 0 : index
    %11 = vector.load %arg2[%c0_10, %c0_11, %c0_12] : memref<2x64x32xbf16, #tpu.memory_space<vmem>>, vector<2x64x32xbf16>
    %cst_13 = arith.constant 0.000000e+00 : bf16
    %12 = vector.broadcast %cst_13 : bf16 to vector<2x64x32xbf16>
    %13 = arith.maximumf %11, %12 : vector<2x64x32xbf16>
    %14 = arith.truncf %10 : vector<2x1x64xf32> to vector<2x1x64xbf16>
    "tpu.trace_start"() <{level = 10 : i32, message = "bqt,btd->bqd"}> : () -> ()
    %cst_14 = arith.constant dense<0.000000e+00> : vector<2x1x32xf32>
    %15 = tpu.matmul %14, %13, %cst_14 {dimension_numbers = #tpu.dot_dimension_numbers<[2], [1], [1], [2], [0, 0, 0, 1, 1, 2], [0], [0]>} : vector<2x1x64xbf16>, vector<2x64x32xbf16>, vector<2x1x32xf32> -> vector<2x1x32xf32>
    "tpu.trace_stop"() : () -> ()
    %16 = vector.shape_cast %15 : vector<2x1x32xf32> to vector<2x32xf32>
    %c0_15 = arith.constant 0 : index
    %c0_16 = arith.constant 0 : index
    %17 = vector.load %arg3[%c0_15, %c0_16] : memref<2x32xf32, #tpu.memory_space<vmem>>, vector<2x32xf32>
    tpu.vector_store %arg3[%c0_15, %c0_16], %16 {strides = array<i32>} : memref<2x32xf32, #tpu.memory_space<vmem>>, vector<2x32xf32>,
    return
  }
  func.func @transform_0(%arg0: i32) -> (i32, i32, i32, i32) {
    %c0_i32 = arith.constant 0 : i32
    %c0_i32_0 = arith.constant 0 : i32
    %c0_i32_1 = arith.constant 0 : i32
    %c0_i32_2 = arith.constant 0 : i32
    return %arg0, %c0_i32, %c0_i32_0, %c0_i32_1 : i32, i32, i32, i32
  }
  func.func @transform_1(%arg0: i32) -> (i32, i32, i32) {
    %c0_i32 = arith.constant 0 : i32
    %c0_i32_0 = arith.constant 0 : i32
    %c0_i32_1 = arith.constant 0 : i32
    return %arg0, %c0_i32, %c0_i32_0 : i32, i32, i32
  }
  func.func @transform_2(%arg0: i32) -> (i32, i32) {
    %c0_i32 = arith.constant 0 : i32
    %c0_i32_0 = arith.constant 0 : i32
    return %arg0, %c0_i32 : i32, i32
  }
}

</mosaic_0001>

<bundles_post_ra>
// kernel: tpu_custom_call.1
= control target key start
LH: loop header
LB: loop body
LE: loop exit
PB: predicated region body
PF: predicated region fallthrough
CT: control target
= control target key end

     0   :  { %7 = vsyncpa [#allocation3], 0  ;;  %s842_s0 = inlined_call_operand.hbm [shape: bf16[2,3,64,64], index: 0, kind: input, shape index: {}]   ;;  %s843_s1 = inlined_call_operand.vmem [shape: bf16[2,64,32], index: 1, kind: input, shape index: {}]   ;;  %s844_s2 = inlined_call_operand.hbm [shape: f32[2,32], index: 2, kind: output, shape index: {}]  }
   0x1   :  { %8 = vsyncpa [#allocation4], 0  ;;  %s724_s9 = smov [#allocation2]  }
   0x2   :  { %s14_s10 = sshll.u32 %s724_s9, 4  ;;  %s15_s10 = int_to_ptr.vmem [resolvable:$true] %s14_s10 }
   0x3   :  { %s688_s11 = scalar_lea.vmem %s15_s10, 3072  ;;  %p693_p1 = scmp.lt.s32.totalorder %s15_s10, %s15_s10 }
   0x4   :  { %p689_p0 = scmp.ne.s32.totalorder %s15_s10, %s688_s11  ;;  %p694_p2 = scmp.lt.s32.totalorder %s688_s11, %s688_s11 }
   0x6   :  { %p695_p3 = por %p694_p2, %p693_p1 }
   0x8   :  { %p696_p4 = pnand %p695_p3, %p689_p0 }
   0xa   :  { %699 = shalt.err (!%p696_p4)
}
   0xb   :  { %s725_s12 = smov 64   ;;  %s726_s13 = smov 4  }
   0xc   :  { %20 = dma.hbm_to_vmem [thread:$0]  %s842_s0, 3072, %s15_s10, [#allocation3], %s725_s12, %s725_s12, %s726_s13  }
   0xd   :  { %720 = dma.done.wait [#allocation3], 3072  }
   0xe   :  { %721 = vsyncadd [#allocation3], 4294964224  ;;  %v727_v0 = vmov 0.0   ;;  %vm728_vm0 = vmmov 0   ;;  %v664_v1 = vld [vmem:[#allocation2 + $0x38] sm:$0xff]   ;;  %v666_v3 = vld [vmem:[#allocation2 + $0x30] sm:$0xff]  }
   0xf   :  { %585 = vmatprep.subr.bf16.mxu0 %v727_v0  ;;  %597 = vmatprep.subr.bf16.mxu1 %v727_v0  ;;  %v665_v2 = vld [vmem:[#allocation2 + $0x98] sm:$0xff]   ;;  %v667_v4 = vld [vmem:[#allocation2 + $0x90] sm:$0xff]   ;;  %v668_v5 = vld [vmem:[#allocation2 + $0x28] sm:$0xff]   ;;  %vm71_vm1 = vcmask 523264   ;;  %v729_v23 = vmov 0   ;;  %vm505_vm2 = vcmask 1041409  }
  0x10   :  { %593 = vmatprep.mubr.msk.bf16.mxu0 %vm728_vm0, %v727_v0  ;;  %605 = vmatprep.mubr.msk.bf16.mxu1 %vm728_vm0, %v727_v0  ;;  %v669_v6 = vld [vmem:[#allocation2 + $0x88] sm:$0xff]   ;;  %v670_v7 = vld [vmem:[#allocation2 + $0x20] sm:$0xff]   ;;  %v672_v11 = vld [vmem:[#allocation2 + $0x18] sm:$0xff]   ;;  %vm508_vm3 = vcmask 254976  }
  0x11   :  { %586 = vmatpush3.bf16.msra.mxu0 %v664_v1  ;;  %598 = vmatpush3.bf16.msra.mxu1 %v665_v2  ;;  %v671_v8 = vld [vmem:[#allocation2 + $0x80] sm:$0xff]   ;;  %v673_v12 = vld [vmem:[#allocation2 + $0x78] sm:$0xff]   ;;  %v674_v13 = vld [vmem:[#allocation2 + $0x10] sm:$0xff]  }
  0x12   :  { %587 = vmatprep.subr.bf16.mxu0 %v727_v0  ;;  %599 = vmatprep.subr.bf16.mxu1 %v727_v0  ;;  %v28_v9 = vld [vmem:[#allocation2 + $0x40] sm:$0x1]  ;;  %v675_v14 = vld [vmem:[#allocation2 + $0x70] sm:$0xff]   ;;  %v676_v15 = vld [vmem:[#allocation2 + $0x8] sm:$0xff]  }
  0x13   :  { %v29_v10 = vld [vmem:[#allocation2 + $0xa0] sm:$0x1]  ;;  %v677_v16 = vld [vmem:[#allocation2 + $0x68] sm:$0xff]   ;;  %v340_v19 = vld [vmem:[%s843_s1 + $0x18] sm:$0xf] }
  0x14   :  { %v678_v17 = vld [vmem:[#allocation2] sm:$0xff]   ;;  %v341_v20 = vld [vmem:[%s843_s1 + $0x1c] sm:$0xf]  ;;  %v348_v21 = vld [vmem:[%s843_s1 + $0x38] sm:$0xf]  ;;  %v356_v24 = vmax.bf16 %v729_v23, %v340_v19 }
  0x15   :  { %588 = vmatpush3.bf16.msra.mxu0 %v666_v3  ;;  %600 = vmatpush3.bf16.msra.mxu1 %v667_v4  ;;  %v679_v18 = vld [vmem:[#allocation2 + $0x60] sm:$0xff]   ;;  %v349_v22 = vld [vmem:[%s843_s1 + $0x3c] sm:$0xf]  ;;  %v357_v25 = vmax.bf16 %v729_v23, %v341_v20  ;;  %v364_v26 = vmax.bf16 %v729_v23, %v348_v21  ;;  %v338_v28 = vld [vmem:[%s843_s1 + $0x10] sm:$0xf] }
  0x16   :  { %589 = vmatprep.subr.bf16.mxu0 %v727_v0  ;;  %601 = vmatprep.subr.bf16.mxu1 %v727_v0  ;;  %v365_v27 = vmax.bf16 %v729_v23, %v349_v22  ;;  %v339_v29 = vld [vmem:[%s843_s1 + $0x14] sm:$0xf]  ;;  %v346_v30 = vld [vmem:[%s843_s1 + $0x30] sm:$0xf]  ;;  %v354_v34 = vmax.bf16 %v729_v23, %v338_v28  ;;  %v336_v41 = vld [vmem:[%s843_s1 + $0x8] sm:$0xf] }
  0x17   :  { %v347_v31 = vld [vmem:[%s843_s1 + $0x34] sm:$0xf]  ;;  %v548_v33 = vcombine.low %v356_v24, %v357_v25  ;;  %v355_v35 = vmax.bf16 %v729_v23, %v339_v29  ;;  %v362_v39 = vmax.bf16 %v729_v23, %v346_v30  ;;  %v337_v42 = vld [vmem:[%s843_s1 + $0xc] sm:$0xf]  ;;  %v344_v45 = vld [vmem:[%s843_s1 + $0x28] sm:$0xf]  ;;  %v352_v50 = vmax.bf16 %v729_v23, %v336_v41 }
  0x18   :  { %v553_v38 = vcombine.low %v364_v26, %v365_v27  ;;  %v363_v40 = vmax.bf16 %v729_v23, %v347_v31  ;;  %v345_v46 = vld [vmem:[%s843_s1 + $0x2c] sm:$0xf]  ;;  %v353_v51 = vmax.bf16 %v729_v23, %v337_v42  ;;  %v360_v54 = vmax.bf16 %v729_v23, %v344_v45  ;;  %v334_v60 = vld [vmem:[%s843_s1] sm:$0xf]  ;;  %v335_v61 = vld [vmem:[%s843_s1 + $0x4] sm:$0xf] }
  0x19   :  { %590 = vmatpush3.bf16.msra.mxu0 %v668_v5  ;;  %602 = vmatpush3.bf16.msra.mxu1 %v669_v6  ;;  %v547_v49 = vcombine.low %v354_v34, %v355_v35  ;;  %v361_v55 = vmax.bf16 %v729_v23, %v345_v46  ;;  %v342_v62 = vld [vmem:[%s843_s1 + $0x20] sm:$0xf]  ;;  %v350_v63 = vmax.bf16 %v729_v23, %v334_v60  ;;  %v343_v2 = vld [vmem:[%s843_s1 + $0x24] sm:$0xf]  ;;  %s730_s1 = smov [#allocation5]  }
  0x1a   :  { %591 = vmatprep.subr.bf16.mxu0 %v727_v0  ;;  %603 = vmatprep.subr.bf16.mxu1 %v727_v0  ;;  %v552_v53 = vcombine.low %v362_v39, %v363_v40  ;;  %v546_v58 = vcombine.low %v352_v50, %v353_v51  ;;  %v351_v1 = vmax.bf16 %v729_v23, %v335_v61  ;;  %s516_s18 = sshll.u32 %s730_s1, 4  ;;  %s517_s18 = int_to_ptr.vmem [resolvable:$true] %s516_s18 }
  0x1b   :  { %v551_v59 = vcombine.low %v360_v54, %v361_v55  ;;  %v358_v3 = vmax.bf16 %v729_v23, %v342_v62  ;;  %s700_s19 = scalar_lea.vmem %s517_s18, 32  ;;  %p705_p6 = scmp.lt.s32.totalorder %s517_s18, %s517_s18 }
  0x1c   :  { %v545_v4 = vcombine.low %v350_v63, %v351_v1  ;;  %p701_p5 = scmp.ne.s32.totalorder %s517_s18, %s700_s19  ;;  %p706_p7 = scmp.lt.s32.totalorder %s700_s19, %s700_s19 }
  0x1d   :  { %592 = vmatpush3.bf16.msra.mxu0 %v670_v7  ;;  %604 = vmatpush3.bf16.msra.mxu1 %v671_v8 }
  0x1e   :  { %609 = vmatprep.subr.bf16.mxu0 %v727_v0  ;;  %621 = vmatprep.subr.bf16.mxu1 %v727_v0  ;;  %p707_p8 = por %p706_p7, %p705_p6 }
  0x20   :  { %594 = vmatmul.mubr.msk.bf16.vlgmr.msra.gmra.mxu0 %vm71_vm1, %v28_v9  ;;  %606 = vmatmul.mubr.msk.bf16.vlgmr.msra.gmra.mxu1 %vm71_vm1, %v29_v10  ;;  %p708_p9 = pnand %p707_p8, %p701_p5 }
  0x21   :  { %610 = vmatpush3.bf16.msra.mxu0 %v672_v11  ;;  %622 = vmatpush3.bf16.msra.mxu1 %v673_v12 }
  0x22   :  { %611 = vmatprep.subr.bf16.mxu0 %v727_v0  ;;  %623 = vmatprep.subr.bf16.mxu1 %v727_v0 }
  0x23   :  { %617 = vmatprep.mubr.msk.bf16.mxu0 %vm728_vm0, %v727_v0  ;;  %629 = vmatprep.mubr.msk.bf16.mxu1 %vm728_vm0, %v727_v0 }
  0x25   :  { %612 = vmatpush3.bf16.msra.mxu0 %v674_v13  ;;  %624 = vmatpush3.bf16.msra.mxu1 %v675_v14 }
  0x26   :  { %613 = vmatprep.subr.bf16.mxu0 %v727_v0  ;;  %625 = vmatprep.subr.bf16.mxu1 %v727_v0 }
  0x29   :  { %614 = vmatpush3.bf16.msra.mxu0 %v676_v15  ;;  %626 = vmatpush3.bf16.msra.mxu1 %v677_v16 }
  0x2a   :  { %615 = vmatprep.subr.bf16.mxu0 %v727_v0  ;;  %627 = vmatprep.subr.bf16.mxu1 %v727_v0 }
  0x2d   :  { %616 = vmatpush3.bf16.msra.mxu0 %v678_v17  ;;  %628 = vmatpush3.bf16.msra.mxu1 %v679_v18 }
  0x2e   :  { %633 = vmatprep.subr.bf16.mxu0 %v727_v0  ;;  %645 = vmatprep.subr.bf16.mxu1 %v727_v0 }
  0xe0   :  { %v109_v32 = vpop.f32.mrf.mxu0  ;;  %v176_v37 = vpop.f32.mrf.mxu1 }
  0xe1   :  { %v198_v36 = vpack.c.bf16 %v109_v32, %v109_v32  ;;  %v199_v43 = vpack.c.bf16 %v176_v37, %v176_v37 }
  0xe2   :  { %v595_v44 = vpop.f32.mrf.mxu0  ;;  %v607_v47 = vpop.f32.mrf.mxu1 }
  0xe3   :  { %618 = vmatmul.mubr.msk.bf16.vlgmr.msra.gmra.mxu0 %vm71_vm1, %v198_v36  ;;  %630 = vmatmul.mubr.msk.bf16.vlgmr.msra.gmra.mxu1 %vm71_vm1, %v199_v43 }
  0xe4   :  { %v112_v48 = vpop.f32.mrf.mxu0  ;;  %634 = vmatpush3.bf16.msra.mxu0 %v548_v33  ;;  %v179_v52 = vpop.f32.mrf.mxu1  ;;  %646 = vmatpush3.bf16.msra.mxu1 %v553_v38 }
  0xe5   :  { %635 = vmatprep.subr.bf16.mxu0 %v727_v0  ;;  %647 = vmatprep.subr.bf16.mxu1 %v727_v0 }
  0xe6   :  { %v596_v56 = vpop.f32.mrf.mxu0  ;;  %641 = vmatprep.mubr.msk.bf16.mxu0 %vm728_vm0, %v727_v0  ;;  %v608_v57 = vpop.f32.mrf.mxu1  ;;  %653 = vmatprep.mubr.msk.bf16.mxu1 %vm728_vm0, %v727_v0 }
  0xe8   :  { %636 = vmatpush3.bf16.msra.mxu0 %v547_v49  ;;  %648 = vmatpush3.bf16.msra.mxu1 %v552_v53 }
  0xe9   :  { %637 = vmatprep.subr.bf16.mxu0 %v727_v0  ;;  %649 = vmatprep.subr.bf16.mxu1 %v727_v0 }
  0xec   :  { %638 = vmatpush3.bf16.msra.mxu0 %v546_v58  ;;  %650 = vmatpush3.bf16.msra.mxu1 %v551_v59 }
  0xed   :  { %639 = vmatprep.subr.bf16.mxu0 %v727_v0  ;;  %651 = vmatprep.subr.bf16.mxu1 %v727_v0  ;;  %v359_v0 = vmax.bf16 %v729_v23, %v343_v2 }
  0xef   :  { %v550_v5 = vcombine.low %v358_v3, %v359_v0 }
  0xf0   :  { %640 = vmatpush3.bf16.msra.mxu0 %v545_v4 }
  0xf1   :  { %652 = vmatpush3.bf16.msra.mxu1 %v550_v5 }
 0x1a3   :  { %v261_v6 = vpop.f32.mrf.mxu0  ;;  %v328_v8 = vpop.f32.mrf.mxu1 }
 0x1a4   :  { %v366_v7 = vpack.c.bf16 %v261_v6, %v261_v6  ;;  %v367_v9 = vpack.c.bf16 %v328_v8, %v328_v8 }
 0x1a5   :  { %v619_v10 = vpop.f32.mrf.mxu0  ;;  %v631_v11 = vpop.f32.mrf.mxu1 }
 0x1a6   :  { %642 = vmatmul.mubr.msk.bf16.vlgmr.msra.gmra.mxu0 %vm71_vm1, %v366_v7  ;;  %654 = vmatmul.mubr.msk.bf16.vlgmr.msra.gmra.mxu1 %vm71_vm1, %v367_v9 }
 0x1a7   :  { %v264_v12 = vpop.f32.mrf.mxu0  ;;  %v331_v13 = vpop.f32.mrf.mxu1 }
 0x1a9   :  { %v620_v14 = vpop.f32.mrf.mxu0  ;;  %v632_v15 = vpop.f32.mrf.mxu1 }
 0x266   :  { %v429_v16 = vpop.f32.mrf.mxu0  ;;  %v496_v17 = vpop.f32.mrf.mxu1 }
 0x267   :  { %v504_v18 = vrot.slane %v496_v17, 7 }
 0x268   :  { %v643_v19 = vpop.f32.mrf.mxu0  ;;  %v655_v20 = vpop.f32.mrf.mxu1 }
 0x269   :  { %v506_v22 = vsel %vm505_vm2, %v504_v18, %v429_v16 }
 0x26a   :  { %v432_v21 = vpop.f32.mrf.mxu0  ;;  %v499_v23 = vpop.f32.mrf.mxu1  ;;  %509 = vst.msk [vmem:[#allocation5] sm:$0x3] %vm508_vm3, %v506_v22 }
 0x26c   :  { %v644_v24 = vpop.f32.mrf.mxu0 }
 0x26d   :  { %711 = shalt.err (!%p708_p9)
}
 0x26e   :  { %519 = dma.vmem_to_hbm [thread:$0]  %s517_s18, 32, %s844_s2, [#allocation4]   ;;  %v656_v25 = vpop.f32.mrf.mxu1 }
 0x26f   :  { %722 = dma.done.wait [#allocation4], 32  }
 0x270   :  { %723 = vsyncadd [#allocation4], 4294967264 }
 0x271   :  { %523 = vsyncpa [#allocation3], 1 }
 0x272   :  { %524 = vsyncpa [#allocation4], 1 }

</bundles_post_ra>
